<compile_context>
chip_gen: v5e
topology: v5e:2x2
jax: 0.10.0
libtpu: 0.0.40
codegen_flags: <defaults>
</compile_context>

<pallas_src>
import functools

import jax
import jax.numpy as jnp
from jax.experimental import pallas as pl
from jax.experimental.pallas import tpu as pltpu

# ----------------------------- model sizes ---------------------------------
D_DATA = 8     # DLL feature dim (data)
D_CTX  = 4     # kinematic context dim
HID    = 32    # hidden width of Generator / Critic MLPs
LEAK   = 0.2   # LeakyReLU slope

TILE_B = 8     # batch rows per grid step (multiple of 8 sublanes)
LANES  = 128   # lane-dense partial-loss output width


def _ceil8(n):
    return ((n + 7) // 8) * 8


# ------------------------ packed parameter slab layout -----------------------
# One [SLAB_ROWS, HID] f32 slab per MLP; every sub-block starts on an
# 8-row boundary so static slices stay sublane-aligned.
OFF_WD = 0                         # (D_DATA, HID)
OFF_WC = OFF_WD + _ceil8(D_DATA)   # (D_CTX,  HID)
OFF_B1 = OFF_WC + _ceil8(D_CTX)    # (1, HID)
OFF_W2 = OFF_B1 + 8                # (HID, HID)
OFF_B2 = OFF_W2 + HID              # (1, HID)
OFF_W3 = OFF_B2 + 8                # generator: (HID, D_DATA); critic: W3^T row (1, HID)
OFF_B3 = OFF_W3 + HID              # generator: (1, D_DATA);   critic: scalar at [.,0]
SLAB_ROWS = OFF_B3 + 8             # 104 rows x 32 lanes x 4 B ~= 13 KiB


def _pack_generator(Wd, Wc, b1, W2, b2, W3, b3):
    slab = jnp.zeros((SLAB_ROWS, HID), jnp.float32)
    slab = slab.at[OFF_WD:OFF_WD + D_DATA, :].set(Wd)
    slab = slab.at[OFF_WC:OFF_WC + D_CTX, :].set(Wc)
    slab = slab.at[OFF_B1, :].set(b1.reshape(-1))
    slab = slab.at[OFF_W2:OFF_W2 + HID, :].set(W2)
    slab = slab.at[OFF_B2, :].set(b2.reshape(-1))
    slab = slab.at[OFF_W3:OFF_W3 + HID, :D_DATA].set(W3)
    slab = slab.at[OFF_B3, :D_DATA].set(b3.reshape(-1))
    return slab


def _pack_critic(Wd, Wc, b1, W2, b2, W3, b3):
    slab = jnp.zeros((SLAB_ROWS, HID), jnp.float32)
    slab = slab.at[OFF_WD:OFF_WD + D_DATA, :].set(Wd)
    slab = slab.at[OFF_WC:OFF_WC + D_CTX, :].set(Wc)
    slab = slab.at[OFF_B1, :].set(b1.reshape(-1))
    slab = slab.at[OFF_W2:OFF_W2 + HID, :].set(W2)
    slab = slab.at[OFF_B2, :].set(b2.reshape(-1))
    slab = slab.at[OFF_W3, :].set(W3.reshape(-1))      # W3^T stored as one row
    slab = slab.at[OFF_B3, 0].set(b3.reshape(-1)[0])   # scalar bias
    return slab


# ------------------------------- kernel math ---------------------------------
def _leaky(x):
    return jnp.where(x > 0, x, LEAK * x)


def _generator_fwd(d, c, g_ref):
    """G(d, c): 3-layer MLP; concat(d, c) expressed as a split first layer."""
    Wd = g_ref[OFF_WD:OFF_WD + D_DATA, :]
    Wc = g_ref[OFF_WC:OFF_WC + D_CTX, :]
    b1 = g_ref[OFF_B1:OFF_B1 + 1, :]
    W2 = g_ref[OFF_W2:OFF_W2 + HID, :]
    b2 = g_ref[OFF_B2:OFF_B2 + 1, :]
    W3 = g_ref[OFF_W3:OFF_W3 + HID, :D_DATA]
    b3 = g_ref[OFF_B3:OFF_B3 + 1, :D_DATA]

    h = _leaky(jnp.dot(d, Wd, preferred_element_type=jnp.float32)
               + jnp.dot(c, Wc, preferred_element_type=jnp.float32) + b1)
    h = _leaky(jnp.dot(h, W2, preferred_element_type=jnp.float32) + b2)
    return jnp.dot(h, W3, preferred_element_type=jnp.float32) + b3   # (TB, D_DATA)


# ------------------------------- kernels --------------------------------------
def _generate_kernel(data_ref, ctx_ref, g_ref, out_ref):
    out_ref[...] = _generator_fwd(data_ref[...], ctx_ref[...], g_ref)


def _train_kernel(data_ref, ctx_ref, w_ref, g_ref, c_ref, out_ref):
    """Fused trainC/trainG per batch-tile partial numerators (wgan)."""
    d = data_ref[...]          # (TB, D_DATA)
    c = ctx_ref[...]           # (TB, D_CTX)
    w = w_ref[...]             # (TB, 1)

    # Generator forward (.detach() is a no-op for forward values).
    fake = _generator_fwd(d, c, g_ref)

    # Critic parameters (static slab slices).
    cWd = c_ref[OFF_WD:OFF_WD + D_DATA, :]
    cWc = c_ref[OFF_WC:OFF_WC + D_CTX, :]
    cb1 = c_ref[OFF_B1:OFF_B1 + 1, :]
    cW2 = c_ref[OFF_W2:OFF_W2 + HID, :]
    cb2 = c_ref[OFF_B2:OFF_B2 + 1, :]
    cw3 = c_ref[OFF_W3:OFF_W3 + 1, :]        # (1, HID) = W3^T
    cb3 = c_ref[OFF_B3:OFF_B3 + 1, 0:1]      # (1, 1)

    # Shared context contribution of the critic first layer (hoisted: reused
    # for both the real and the fake pass).
    ctx_h = jnp.dot(c, cWc, preferred_element_type=jnp.float32) + cb1

    def critic_hidden(x):
        h1 = _leaky(jnp.dot(x, cWd, preferred_element_type=jnp.float32) + ctx_h)
        return _leaky(jnp.dot(h1, cW2, preferred_element_type=jnp.float32) + cb2)

    h_real = critic_hidden(d)       # (TB, HID)
    h_fake = critic_hidden(fake)    # (TB, HID)

    # Final critic layer as a VPU/XLU lane reduction (no padded (HID,1) MXU op).
    s_real = jnp.sum(h_real * cw3, axis=-1, keepdims=True) + cb3   # (TB, 1)
    s_fake = jnp.sum(h_fake * cw3, axis=-1, keepdims=True) + cb3   # (TB, 1)

    # Per-tile partial numerators; /B and the generator-loss sign live in the
    # wrapper (padded rows carry weight 0 so they contribute nothing).
    pc = jnp.sum(w * (s_fake - s_real), axis=(0, 1), keepdims=True)   # (1, 1)
    pg = jnp.sum(w * s_fake, axis=(0, 1), keepdims=True)              # (1, 1)

    lane = jax.lax.broadcasted_iota(jnp.int32, (1, 1, LANES), 2)
    out_ref[...] = jnp.where(lane == 0, pc, jnp.where(lane == 1, pg, 0.0))


# ----------------------------- pallas wrappers --------------------------------
def _pad_batch(x, b_pad):
    pad = b_pad - x.shape[0]
    if pad == 0:
        return x
    return jnp.pad(x, ((0, pad), (0, 0)))


@jax.jit
def _losses_call(data, context, weight, g_slab, c_slab):
    b_full = data.shape[0]
    b_pad = _ceil8(max(b_full, TILE_B))
    b_pad = ((b_pad + TILE_B - 1) // TILE_B) * TILE_B
    data_p = _pad_batch(data, b_pad)
    ctx_p = _pad_batch(context, b_pad)
    w_p = _pad_batch(weight, b_pad)          # padded rows: weight 0
    nt = b_pad // TILE_B

    partials = pl.pallas_call(
        _train_kernel,
        out_shape=jax.ShapeDtypeStruct((nt, 1, LANES), jnp.float32),
        grid=(nt,),
        in_specs=[
            pl.BlockSpec((TILE_B, D_DATA), lambda i: (i, 0)),
            pl.BlockSpec((TILE_B, D_CTX), lambda i: (i, 0)),
            pl.BlockSpec((TILE_B, 1), lambda i: (i, 0)),
            pl.BlockSpec((SLAB_ROWS, HID), lambda i: (0, 0)),   # resident slab
            pl.BlockSpec((SLAB_ROWS, HID), lambda i: (0, 0)),   # resident slab
        ],
        out_specs=pl.BlockSpec((1, 1, LANES), lambda i: (i, 0, 0)),
        compiler_params=pltpu.CompilerParams(
            dimension_semantics=("parallel",)),
    )(data_p, ctx_p, w_p, g_slab, c_slab)

    tot = jnp.sum(partials, axis=(0, 1))       # (LANES,)
    inv_b = 1.0 / float(b_full)
    loss_c = tot[0] * inv_b                    # mean(w * (C(fake) - C(real)))
    loss_g = -tot[1] * inv_b                   # -mean(w * C(fake))
    return loss_c, loss_g


@jax.jit
def _generate_call(data, context, g_slab):
    b_full = data.shape[0]
    b_pad = ((max(b_full, TILE_B) + TILE_B - 1) // TILE_B) * TILE_B
    data_p = _pad_batch(data, b_pad)
    ctx_p = _pad_batch(context, b_pad)
    nt = b_pad // TILE_B

    fake = pl.pallas_call(
        _generate_kernel,
        out_shape=jax.ShapeDtypeStruct((b_pad, D_DATA), jnp.float32),
        grid=(nt,),
        in_specs=[
            pl.BlockSpec((TILE_B, D_DATA), lambda i: (i, 0)),
            pl.BlockSpec((TILE_B, D_CTX), lambda i: (i, 0)),
            pl.BlockSpec((SLAB_ROWS, HID), lambda i: (0, 0)),
        ],
        out_specs=pl.BlockSpec((TILE_B, D_DATA), lambda i: (i, 0)),
        compiler_params=pltpu.CompilerParams(
            dimension_semantics=("parallel",)),
    )(data_p, ctx_p, g_slab)
    return fake[:b_full]


class RichGANPallas:
    """JAX/Pallas re-implementation of RICHGAN.forward (wgan, no GP)."""

    def __init__(self, g_params, c_params):
        self.g_slab = _pack_generator(*g_params)
        self.c_slab = _pack_critic(*c_params)

    def __call__(self, module, *args, **kwargs):
        if module == 'G':
            return self.trainG(*args, **kwargs)
        if module == 'C':
            return self.trainC(*args, **kwargs)

    def train_losses(self, data, context, weight):
        """Fused single-launch path returning (loss_C, loss_G)."""
        return _losses_call(data, context, weight, self.g_slab, self.c_slab)

    def trainC(self, data, context, weight, mode='train'):
        loss_c, _ = self.train_losses(data, context, weight)
        return loss_c       # LossWeighter.combine_losses: single loss, weight 1.0

    def trainG(self, data, context, weight, mode='train'):
        _, loss_g = self.train_losses(data, context, weight)
        return loss_g

    def generate(self, data, context):
        return _generate_call(data, context, self.g_slab)


# ----------------------------- parameter init ---------------------------------
def _init_mlp(key, d_in_data, d_in_ctx, hid, d_out):
    ks = jax.random.split(key, 4)
    s1 = 1.0 / jnp.sqrt(d_in_data + d_in_ctx)
    s2 = 1.0 / jnp.sqrt(hid)
    Wd = jax.random.normal(ks[0], (d_in_data, hid), jnp.float32) * s1
    Wc = jax.random.normal(ks[1], (d_in_ctx, hid), jnp.float32) * s1
    b1 = jnp.zeros((1, hid), jnp.float32)
    W2 = jax.random.normal(ks[2], (hid, hid), jnp.float32) * s2
    b2 = jnp.zeros((1, hid), jnp.float32)
    W3 = jax.random.normal(ks[3], (hid, d_out), jnp.float32) * s2
    b3 = jnp.zeros((1, d_out), jnp.float32)
    return (Wd, Wc, b1, W2, b2, W3, b3)


def _ref_mlp(d, c, params):
    Wd, Wc, b1, W2, b2, W3, b3 = params
    h = jnp.where(d @ Wd + c @ Wc + b1 > 0, d @ Wd + c @ Wc + b1,
                  LEAK * (d @ Wd + c @ Wc + b1))
    z = h @ W2 + b2
    h = jnp.where(z > 0, z, LEAK * z)
    return h @ W3 + b3


if __name__ == "__main__":
    B = 32   # multiple of TILE_B so the grid has several parallel steps

    key = jax.random.PRNGKey(0)
    k_data, k_ctx, k_w, k_g, k_c = jax.random.split(key, 5)

    data = jax.random.normal(k_data, (B, D_DATA), jnp.float32)
    context = jax.random.normal(k_ctx, (B, D_CTX), jnp.float32)
    weight = jax.random.uniform(k_w, (B, 1), jnp.float32, 0.5, 1.5)

    g_params = _init_mlp(k_g, D_DATA, D_CTX, HID, D_DATA)   # Generator
    c_params = _init_mlp(k_c, D_DATA, D_CTX, HID, 1)        # Critic

    model = RichGANPallas(g_params, c_params)

    # Fused single-launch path (both losses) + module-style dispatch.
    loss_c, loss_g = model.train_losses(data, context, weight)
    loss_c2 = model('C', data, context, weight, mode='train')
    loss_g2 = model('G', data, context, weight, mode='train')
    fake = model.generate(data, context)
    jax.block_until_ready((loss_c, loss_g, loss_c2, loss_g2, fake))

    assert loss_c.shape == () and loss_g.shape == ()
    assert fake.shape == (B, D_DATA)

    # Pure-JAX reference check (wgan, no GP).
    fake_ref = _ref_mlp(data, context, g_params)
    s_real_ref = _ref_mlp(data, context, c_params)
    s_fake_ref = _ref_mlp(fake_ref, context, c_params)
    loss_c_ref = jnp.mean(weight * (s_fake_ref - s_real_ref))
    loss_g_ref = -jnp.mean(weight * s_fake_ref)

    assert jnp.max(jnp.abs(fake - fake_ref)) < 1e-3
    assert abs(float(loss_c) - float(loss_c_ref)) < 1e-3
    assert abs(float(loss_g) - float(loss_g_ref)) < 1e-3
    assert abs(float(loss_c2) - float(loss_c_ref)) < 1e-3
    assert abs(float(loss_g2) - float(loss_g_ref)) < 1e-3

    print("KERNEL_OK")
</pallas_src>

<mosaic_0001>
module attributes {stable_mosaic.version = 11 : i64} {
  func.func @_train_kernel(%arg0: i32, %arg1: memref<8x8xf32, #tpu.memory_space<vmem>>, %arg2: memref<8x4xf32, #tpu.memory_space<vmem>>, %arg3: memref<8x1xf32, #tpu.memory_space<vmem>>, %arg4: memref<104x32xf32, #tpu.memory_space<vmem>>, %arg5: memref<104x32xf32, #tpu.memory_space<vmem>>, %arg6: memref<1x1x128xf32, #tpu.memory_space<vmem>>) attributes {dimension_semantics = [#tpu.dimension_semantics<parallel>], iteration_bounds = array<i64: 4>, scalar_prefetch = 0 : i64, scratch_operands = 0 : i64, tpu.core_type = #tpu.core_type<tc>, window_params = [{transform_indices = @transform_0, window_bounds = array<i64: 8, 8>}, {transform_indices = @transform_1, window_bounds = array<i64: 8, 4>}, {transform_indices = @transform_2, window_bounds = array<i64: 8, 1>}, {pipeline_mode = #tpu.pipeline_mode<synchronous>, transform_indices = @transform_3, window_bounds = array<i64: 104, 32>}, {pipeline_mode = #tpu.pipeline_mode<synchronous>, transform_indices = @transform_4, window_bounds = array<i64: 104, 32>}, {transform_indices = @transform_5, window_bounds = array<i64: 1, 1, 128>}]} {
    %c0 = arith.constant 0 : index
    %c0_0 = arith.constant 0 : index
    %0 = vector.load %arg1[%c0, %c0_0] : memref<8x8xf32, #tpu.memory_space<vmem>>, vector<8x8xf32>
    %c0_1 = arith.constant 0 : index
    %c0_2 = arith.constant 0 : index
    %1 = vector.load %arg2[%c0_1, %c0_2] : memref<8x4xf32, #tpu.memory_space<vmem>>, vector<8x4xf32>
    %c0_3 = arith.constant 0 : index
    %c0_4 = arith.constant 0 : index
    %2 = vector.load %arg3[%c0_3, %c0_4] : memref<8x1xf32, #tpu.memory_space<vmem>>, vector<8x1xf32>
    %c0_5 = arith.constant 0 : index
    %c0_6 = arith.constant 0 : index
    %3 = vector.load %arg4[%c0_5, %c0_6] : memref<104x32xf32, #tpu.memory_space<vmem>>, vector<8x32xf32>
    %c8 = arith.constant 8 : index
    %c0_7 = arith.constant 0 : index
    %4 = vector.load %arg4[%c8, %c0_7] : memref<104x32xf32, #tpu.memory_space<vmem>>, vector<4x32xf32>
    %c16 = arith.constant 16 : index
    %c0_8 = arith.constant 0 : index
    %5 = vector.load %arg4[%c16, %c0_8] : memref<104x32xf32, #tpu.memory_space<vmem>>, vector<1x32xf32>
    %c24 = arith.constant 24 : index
    %c0_9 = arith.constant 0 : index
    %6 = vector.load %arg4[%c24, %c0_9] : memref<104x32xf32, #tpu.memory_space<vmem>>, vector<32x32xf32>
    %c56 = arith.constant 56 : index
    %c0_10 = arith.constant 0 : index
    %7 = vector.load %arg4[%c56, %c0_10] : memref<104x32xf32, #tpu.memory_space<vmem>>, vector<1x32xf32>
    %c64 = arith.constant 64 : index
    %c0_11 = arith.constant 0 : index
    %8 = vector.load %arg4[%c64, %c0_11] : memref<104x32xf32, #tpu.memory_space<vmem>>, vector<32x8xf32>
    %c96 = arith.constant 96 : index
    %c0_12 = arith.constant 0 : index
    %9 = vector.load %arg4[%c96, %c0_12] : memref<104x32xf32, #tpu.memory_space<vmem>>, vector<1x8xf32>
    %cst = arith.constant dense<0.000000e+00> : vector<8x32xf32>
    %10 = tpu.matmul %0, %3, %cst {dimension_numbers = #tpu.dot_dimension_numbers<[1], [0], [0], [1], [0, 0, 1, 1], [], []>} : vector<8x8xf32>, vector<8x32xf32>, vector<8x32xf32> -> vector<8x32xf32>
    %cst_13 = arith.constant dense<0.000000e+00> : vector<8x32xf32>
    %11 = tpu.matmul %1, %4, %cst_13 {dimension_numbers = #tpu.dot_dimension_numbers<[1], [0], [0], [1], [0, 0, 1, 1], [], []>} : vector<8x4xf32>, vector<4x32xf32>, vector<8x32xf32> -> vector<8x32xf32>
    %12 = arith.addf %10, %11 : vector<8x32xf32>
    %13 = vector.broadcast %5 : vector<1x32xf32> to vector<8x32xf32>
    %14 = arith.addf %12, %13 : vector<8x32xf32>
    %cst_14 = arith.constant 0.000000e+00 : f32
    %15 = vector.broadcast %cst_14 : f32 to vector<8x32xf32>
    %16 = arith.cmpf ogt, %14, %15 : vector<8x32xf32>
    %cst_15 = arith.constant 2.000000e-01 : f32
    %17 = vector.broadcast %cst_15 : f32 to vector<8x32xf32>
    %18 = arith.mulf %17, %14 : vector<8x32xf32>
    %19 = arith.select %16, %14, %18 : vector<8x32xi1>, vector<8x32xf32>
    %cst_16 = arith.constant dense<0.000000e+00> : vector<8x32xf32>
    %20 = tpu.matmul %19, %6, %cst_16 {dimension_numbers = #tpu.dot_dimension_numbers<[1], [0], [0], [1], [0, 0, 1, 1], [], []>} : vector<8x32xf32>, vector<32x32xf32>, vector<8x32xf32> -> vector<8x32xf32>
    %21 = vector.broadcast %7 : vector<1x32xf32> to vector<8x32xf32>
    %22 = arith.addf %20, %21 : vector<8x32xf32>
    %cst_17 = arith.constant 0.000000e+00 : f32
    %23 = vector.broadcast %cst_17 : f32 to vector<8x32xf32>
    %24 = arith.cmpf ogt, %22, %23 : vector<8x32xf32>
    %cst_18 = arith.constant 2.000000e-01 : f32
    %25 = vector.broadcast %cst_18 : f32 to vector<8x32xf32>
    %26 = arith.mulf %25, %22 : vector<8x32xf32>
    %27 = arith.select %24, %22, %26 : vector<8x32xi1>, vector<8x32xf32>
    %cst_19 = arith.constant dense<0.000000e+00> : vector<8x8xf32>
    %28 = tpu.matmul %27, %8, %cst_19 {dimension_numbers = #tpu.dot_dimension_numbers<[1], [0], [0], [1], [0, 0, 1, 1], [], []>} : vector<8x32xf32>, vector<32x8xf32>, vector<8x8xf32> -> vector<8x8xf32>
    %29 = vector.broadcast %9 : vector<1x8xf32> to vector<8x8xf32>
    %30 = arith.addf %28, %29 : vector<8x8xf32>
    %c0_20 = arith.constant 0 : index
    %c0_21 = arith.constant 0 : index
    %31 = vector.load %arg5[%c0_20, %c0_21] : memref<104x32xf32, #tpu.memory_space<vmem>>, vector<8x32xf32>
    %c8_22 = arith.constant 8 : index
    %c0_23 = arith.constant 0 : index
    %32 = vector.load %arg5[%c8_22, %c0_23] : memref<104x32xf32, #tpu.memory_space<vmem>>, vector<4x32xf32>
    %c16_24 = arith.constant 16 : index
    %c0_25 = arith.constant 0 : index
    %33 = vector.load %arg5[%c16_24, %c0_25] : memref<104x32xf32, #tpu.memory_space<vmem>>, vector<1x32xf32>
    %c24_26 = arith.constant 24 : index
    %c0_27 = arith.constant 0 : index
    %34 = vector.load %arg5[%c24_26, %c0_27] : memref<104x32xf32, #tpu.memory_space<vmem>>, vector<32x32xf32>
    %c56_28 = arith.constant 56 : index
    %c0_29 = arith.constant 0 : index
    %35 = vector.load %arg5[%c56_28, %c0_29] : memref<104x32xf32, #tpu.memory_space<vmem>>, vector<1x32xf32>
    %c64_30 = arith.constant 64 : index
    %c0_31 = arith.constant 0 : index
    %36 = vector.load %arg5[%c64_30, %c0_31] : memref<104x32xf32, #tpu.memory_space<vmem>>, vector<1x32xf32>
    %c96_32 = arith.constant 96 : index
    %c0_33 = arith.constant 0 : index
    %37 = vector.load %arg5[%c96_32, %c0_33] : memref<104x32xf32, #tpu.memory_space<vmem>>, vector<1x1xf32>
    %cst_34 = arith.constant dense<0.000000e+00> : vector<8x32xf32>
    %38 = tpu.matmul %1, %32, %cst_34 {dimension_numbers = #tpu.dot_dimension_numbers<[1], [0], [0], [1], [0, 0, 1, 1], [], []>} : vector<8x4xf32>, vector<4x32xf32>, vector<8x32xf32> -> vector<8x32xf32>
    %39 = vector.broadcast %33 : vector<1x32xf32> to vector<8x32xf32>
    %40 = arith.addf %38, %39 : vector<8x32xf32>
    %cst_35 = arith.constant dense<0.000000e+00> : vector<8x32xf32>
    %41 = tpu.matmul %0, %31, %cst_35 {dimension_numbers = #tpu.dot_dimension_numbers<[1], [0], [0], [1], [0, 0, 1, 1], [], []>} : vector<8x8xf32>, vector<8x32xf32>, vector<8x32xf32> -> vector<8x32xf32>
    %42 = arith.addf %41, %40 : vector<8x32xf32>
    %cst_36 = arith.constant 0.000000e+00 : f32
    %43 = vector.broadcast %cst_36 : f32 to vector<8x32xf32>
    %44 = arith.cmpf ogt, %42, %43 : vector<8x32xf32>
    %cst_37 = arith.constant 2.000000e-01 : f32
    %45 = vector.broadcast %cst_37 : f32 to vector<8x32xf32>
    %46 = arith.mulf %45, %42 : vector<8x32xf32>
    %47 = arith.select %44, %42, %46 : vector<8x32xi1>, vector<8x32xf32>
    %cst_38 = arith.constant dense<0.000000e+00> : vector<8x32xf32>
    %48 = tpu.matmul %47, %34, %cst_38 {dimension_numbers = #tpu.dot_dimension_numbers<[1], [0], [0], [1], [0, 0, 1, 1], [], []>} : vector<8x32xf32>, vector<32x32xf32>, vector<8x32xf32> -> vector<8x32xf32>
    %49 = vector.broadcast %35 : vector<1x32xf32> to vector<8x32xf32>
    %50 = arith.addf %48, %49 : vector<8x32xf32>
    %cst_39 = arith.constant 0.000000e+00 : f32
    %51 = vector.broadcast %cst_39 : f32 to vector<8x32xf32>
    %52 = arith.cmpf ogt, %50, %51 : vector<8x32xf32>
    %cst_40 = arith.constant 2.000000e-01 : f32
    %53 = vector.broadcast %cst_40 : f32 to vector<8x32xf32>
    %54 = arith.mulf %53, %50 : vector<8x32xf32>
    %55 = arith.select %52, %50, %54 : vector<8x32xi1>, vector<8x32xf32>
    %cst_41 = arith.constant dense<0.000000e+00> : vector<8x32xf32>
    %56 = tpu.matmul %30, %31, %cst_41 {dimension_numbers = #tpu.dot_dimension_numbers<[1], [0], [0], [1], [0, 0, 1, 1], [], []>} : vector<8x8xf32>, vector<8x32xf32>, vector<8x32xf32> -> vector<8x32xf32>
    %57 = arith.addf %56, %40 : vector<8x32xf32>
    %cst_42 = arith.constant 0.000000e+00 : f32
    %58 = vector.broadcast %cst_42 : f32 to vector<8x32xf32>
    %59 = arith.cmpf ogt, %57, %58 : vector<8x32xf32>
    %cst_43 = arith.constant 2.000000e-01 : f32
    %60 = vector.broadcast %cst_43 : f32 to vector<8x32xf32>
    %61 = arith.mulf %60, %57 : vector<8x32xf32>
    %62 = arith.select %59, %57, %61 : vector<8x32xi1>, vector<8x32xf32>
    %cst_44 = arith.constant dense<0.000000e+00> : vector<8x32xf32>
    %63 = tpu.matmul %62, %34, %cst_44 {dimension_numbers = #tpu.dot_dimension_numbers<[1], [0], [0], [1], [0, 0, 1, 1], [], []>} : vector<8x32xf32>, vector<32x32xf32>, vector<8x32xf32> -> vector<8x32xf32>
    %64 = vector.broadcast %35 : vector<1x32xf32> to vector<8x32xf32>
    %65 = arith.addf %63, %64 : vector<8x32xf32>
    %cst_45 = arith.constant 0.000000e+00 : f32
    %66 = vector.broadcast %cst_45 : f32 to vector<8x32xf32>
    %67 = arith.cmpf ogt, %65, %66 : vector<8x32xf32>
    %cst_46 = arith.constant 2.000000e-01 : f32
    %68 = vector.broadcast %cst_46 : f32 to vector<8x32xf32>
    %69 = arith.mulf %68, %65 : vector<8x32xf32>
    %70 = arith.select %67, %65, %69 : vector<8x32xi1>, vector<8x32xf32>
    %71 = vector.broadcast %36 : vector<1x32xf32> to vector<8x32xf32>
    %72 = arith.mulf %55, %71 : vector<8x32xf32>
    %cst_47 = arith.constant dense<0.000000e+00> : vector<8xf32>
    %73 = vector.multi_reduction <add>, %72, %cst_47 [1] : vector<8x32xf32> to vector<8xf32>
    %74 = vector.shape_cast %73 : vector<8xf32> to vector<8x1xf32>
    %75 = vector.broadcast %37 : vector<1x1xf32> to vector<8x1xf32>
    %76 = arith.addf %74, %75 : vector<8x1xf32>
    %77 = vector.broadcast %36 : vector<1x32xf32> to vector<8x32xf32>
    %78 = arith.mulf %70, %77 : vector<8x32xf32>
    %cst_48 = arith.constant dense<0.000000e+00> : vector<8xf32>
    %79 = vector.multi_reduction <add>, %78, %cst_48 [1] : vector<8x32xf32> to vector<8xf32>
    %80 = vector.shape_cast %79 : vector<8xf32> to vector<8x1xf32>
    %81 = vector.broadcast %37 : vector<1x1xf32> to vector<8x1xf32>
    %82 = arith.addf %80, %81 : vector<8x1xf32>
    %83 = arith.subf %82, %76 : vector<8x1xf32>
    %84 = arith.mulf %2, %83 : vector<8x1xf32>
    %85 = vector.shape_cast %84 : vector<8x1xf32> to vector<1x8x1xf32>
    %cst_49 = arith.constant dense<0.000000e+00> : vector<1xf32>
    %86 = vector.multi_reduction <add>, %85, %cst_49 [1, 2] : vector<1x8x1xf32> to vector<1xf32>
    %87 = vector.shape_cast %86 : vector<1xf32> to vector<1x1x1xf32>
    %88 = vector.extract %87[0, 0, 0] : f32 from vector<1x1x1xf32>
    %89 = vector.broadcast %88 : f32 to vector<1x1xf32>
    %90 = arith.mulf %2, %82 : vector<8x1xf32>
    %91 = vector.shape_cast %90 : vector<8x1xf32> to vector<1x8x1xf32>
    %cst_50 = arith.constant dense<0.000000e+00> : vector<1xf32>
    %92 = vector.multi_reduction <add>, %91, %cst_50 [1, 2] : vector<1x8x1xf32> to vector<1xf32>
    %93 = vector.shape_cast %92 : vector<1xf32> to vector<1x1x1xf32>
    %94 = vector.extract %93[0, 0, 0] : f32 from vector<1x1x1xf32>
    %95 = vector.broadcast %94 : f32 to vector<1x1xf32>
    %96 = tpu.iota {dimensions = array<i32: 2>} : vector<1x1x128xi32>
    %c0_i32 = arith.constant 0 : i32
    %97 = vector.broadcast %c0_i32 : i32 to vector<1x1x128xi32>
    %98 = arith.cmpi eq, %96, %97 : vector<1x1x128xi32>
    %c1_i32 = arith.constant 1 : i32
    %99 = vector.broadcast %c1_i32 : i32 to vector<1x1x128xi32>
    %100 = arith.cmpi eq, %96, %99 : vector<1x1x128xi32>
    %cst_51 = arith.constant 0.000000e+00 : f32
    %101 = vector.shape_cast %95 : vector<1x1xf32> to vector<1x1x1xf32>
    %102 = vector.broadcast %101 : vector<1x1x1xf32> to vector<1x1x128xf32>
    %103 = vector.broadcast %cst_51 : f32 to vector<1x1x128xf32>
    %104 = arith.select %100, %102, %103 : vector<1x1x128xi1>, vector<1x1x128xf32>
    %105 = vector.shape_cast %89 : vector<1x1xf32> to vector<1x1x1xf32>
    %106 = vector.broadcast %105 : vector<1x1x1xf32> to vector<1x1x128xf32>
    %107 = arith.select %98, %106, %104 : vector<1x1x128xi1>, vector<1x1x128xf32>
    %c0_52 = arith.constant 0 : index
    %c0_53 = arith.constant 0 : index
    %c0_54 = arith.constant 0 : index
    %108 = vector.load %arg6[%c0_52, %c0_53, %c0_54] : memref<1x1x128xf32, #tpu.memory_space<vmem>>, vector<1x1x128xf32>
    tpu.vector_store %arg6[%c0_52, %c0_53, %c0_54], %107 {strides = array<i32>} : memref<1x1x128xf32, #tpu.memory_space<vmem>>, vector<1x1x128xf32>,
    return
  }
  func.func @transform_0(%arg0: i32) -> (i32, i32) {
    %c0_i32 = arith.constant 0 : i32
    %c0_i32_0 = arith.constant 0 : i32
    return %arg0, %c0_i32 : i32, i32
  }
  func.func @transform_1(%arg0: i32) -> (i32, i32) {
    %c0_i32 = arith.constant 0 : i32
    %c0_i32_0 = arith.constant 0 : i32
    return %arg0, %c0_i32 : i32, i32
  }
  func.func @transform_2(%arg0: i32) -> (i32, i32) {
    %c0_i32 = arith.constant 0 : i32
    %c0_i32_0 = arith.constant 0 : i32
    return %arg0, %c0_i32 : i32, i32
  }
  func.func @transform_3(%arg0: i32) -> (i32, i32) {
    %c0_i32 = arith.constant 0 : i32
    %c0_i32_0 = arith.constant 0 : i32
    %c0_i32_1 = arith.constant 0 : i32
    return %c0_i32, %c0_i32_0 : i32, i32
  }
  func.func @transform_4(%arg0: i32) -> (i32, i32) {
    %c0_i32 = arith.constant 0 : i32
    %c0_i32_0 = arith.constant 0 : i32
    %c0_i32_1 = arith.constant 0 : i32
    return %c0_i32, %c0_i32_0 : i32, i32
  }
  func.func @transform_5(%arg0: i32) -> (i32, i32, i32) {
    %c0_i32 = arith.constant 0 : i32
    %c0_i32_0 = arith.constant 0 : i32
    %c0_i32_1 = arith.constant 0 : i32
    return %arg0, %c0_i32, %c0_i32_0 : i32, i32, i32
  }
}

</mosaic_0001>

<bundles_post_ra>
// kernel: _losses_call.1
= control target key start
LH: loop header
LB: loop body
LE: loop exit
PB: predicated region body
PF: predicated region fallthrough
CT: control target
= control target key end

     0   :  { %s707_s18 = smov 0   ;;  %s821_s0 = inlined_call_operand.vmem [shape: f32[32,8], index: 0, kind: input, shape index: {}]   ;;  %s822_s1 = inlined_call_operand.vmem [shape: f32[32,4], index: 1, kind: input, shape index: {}]   ;;  %s823_s2 = inlined_call_operand.vmem [shape: f32[32,1], index: 2, kind: input, shape index: {}]   ;;  %s824_s3 = inlined_call_operand.vmem [shape: f32[104,32], index: 3, kind: input, shape index: {}]   ;;  %s825_s4 = inlined_call_operand.vmem [shape: f32[104,32], index: 4, kind: input, shape index: {}]   ;;  %s826_s5 = inlined_call_operand.vmem [shape: f32[4,1,128], index: 5, kind: output, shape index: {}]  }
   0x1 LB: > { %s629_s19 = sadd.s32 4294967295, %s675_s18   ;;  %p633_p0 = scmp.ge.s32.totalorder %s675_s18, 1  ;;  %s675_s18 = sphi %s707_s18, %s15_s18  }
   0x2   : > { %p204_p1 = scmp.lt.s32.totalorder %s675_s18, 5 }
   0x4   : > { %p205_p2 = pnand %p633_p0, %p204_p1 }
   0x5   : > { %p237_p3 = scmp.lt.s32.totalorder (!%p205_p2), %s629_s19, 3 }
   0x6   : > { %208 = sbr.rel (%p205_p2) target bundleno = 1004 (0x3ec), region = 40 }
   0xb   : > { %v256_v0 = vld [vmem:[%s824_s3 + $0x8] sm:$0xf]  ;;  %vm272_vm0 = vcmask 1043456   ;;  %v255_v1 = vld [vmem:[%s824_s3] sm:$0xff]  ;;  %s828_s19 = smov (!%p237_p3, %s629_s19), 3  ;;  %vm268_vm1 = vcmask 31744  }
   0xc   : > { %637 = vmatpush.msk.msra.mxu0 %vm272_vm0, %v256_v0  ;;  %315 = vmatpush.msra.mxu1 %v255_v1  ;;  %s725_s24 = sshll.u32 %s828_s19, 3  ;;  %vm296_vm2 = vcmask 64512   ;;  %v261_v4 = vld [vmem:[%s824_s3 + $0x30] sm:$0xff]  ;;  %v260_v5 = vld [vmem:[%s824_s3 + $0x28] sm:$0xff]  ;;  %v259_v6 = vld [vmem:[%s824_s3 + $0x20] sm:$0xff]  ;;  %vm326_vm4 = vcmask 261120   ;;  %s251_s10 = scalar_lea.vmem %s826_s5, %s828_s19 }
   0xd   : > { %s244_s27 = scalar_lea.vmem %s822_s1, %s725_s24  ;;  %s240_s30 = scalar_lea.vmem %s821_s0, %s725_s24  ;;  %342 = vmatpush.msra.mxu2 %v261_v4  ;;  %v258_v7 = vld [vmem:[%s824_s3 + $0x18] sm:$0xff]  ;;  %v662_v9 = vld [vmem:[%s824_s3 + $0x10] ss:$0 sm:$0xff]  ;;  %v264_v17 = vld [vmem:[%s824_s3 + $0x48] sm:$0xff]  ;;  %vm527_vm10 = vcmask 7168  }
   0xe   : > { %v253_v2 = vld [vmem:[%s244_s27] sm:$0xff]  ;;  %v266_v8 = vld [vmem:[%s824_s3 + $0x58] sm:$0xff]  ;;  %v265_v16 = vld [vmem:[%s824_s3 + $0x50] sm:$0xff]  ;;  %s248_s6 = scalar_lea.vmem %s823_s2, %s725_s24 }
   0xf   : > { %v252_v3 = vld [vmem:[%s240_s30] sm:$0xff]  ;;  %638 = vmatmul.msk.f32.vlgmr.msra.gmra.mxu0 %vm268_vm1, %v253_v2  ;;  %343 = vmatpush.msra.mxu2 %v260_v5  ;;  %v378_v19 = vld [vmem:[%s825_s4 + $0x8] sm:$0xf]  ;;  %v663_v21 = vld [vmem:[%s824_s3 + $0x38] ss:$0 sm:$0xff] }
  0x10   : > { %639 = vmatmul.msk.f32.vlgmr.msra.gmra.mxu1 %vm296_vm2, %v252_v3  ;;  %369 = vmatpush.msra.mxu3 %v266_v8  ;;  %v263_v18 = vld [vmem:[%s824_s3 + $0x40] sm:$0xff]  ;;  %v665_v26 = vld [vmem:[%s825_s4 + $0x10] ss:$0 sm:$0xff]  ;;  %v382_v29 = vld [vmem:[%s825_s4 + $0x28] sm:$0xff] }
  0x11   : > { %344 = vmatpush.msra.mxu2 %v259_v6  ;;  %v377_v20 = vld [vmem:[%s825_s4] sm:$0xff]  ;;  %642 = vmatpush.msk.msrb.mxu0 %vm272_vm0, %v378_v19  ;;  %v383_v28 = vld [vmem:[%s825_s4 + $0x30] sm:$0xff]  ;;  %v380_v34 = vld [vmem:[%s825_s4 + $0x18] sm:$0xff]  ;;  %v549_v19 = vlaneseq }
  0x12   : > { %370 = vmatpush.msra.mxu3 %v265_v16  ;;  %426 = vmatpush.msrb.mxu1 %v377_v20  ;;  %v381_v32 = vld [vmem:[%s825_s4 + $0x20] sm:$0xff]  ;;  %v666_v40 = vld [vmem:[%s825_s4 + $0x38] ss:$0 sm:$0xff] }
  0x13   : > { %345 = vmatpush.msra.mxu2 %v258_v7  ;;  %502 = vmatpush.msra.mxu0 %v383_v28  ;;  %v664_v37 = vld [vmem:[%s824_s3 + $0x60] ss:$0 sm:$0xff] }
  0x14   : > { %371 = vmatpush.msra.mxu3 %v264_v17  ;;  %v667_v43 = vld [vmem:[%s825_s4 + $0x40] ss:$0 sm:$0xff] }
  0x15   : > { %450 = vmatpush.msrb.mxu2 %v383_v28  ;;  %503 = vmatpush.msra.mxu0 %v382_v29  ;;  %v668_v59 = vld [vmem:[%s825_s4 + $0x60] ss:$0 sm:$0xff] }
  0x16   : > { %372 = vmatpush.msra.mxu3 %v263_v18  ;;  %v254_v0 = vld [vmem:[%s248_s6] sm:$0xff] }
  0x17   : > { %643 = vmatmul.msk.f32.vlgmr.msrb.gmra.mxu0 %vm268_vm1, %v253_v2  ;;  %451 = vmatpush.msrb.mxu2 %v382_v29 }
  0x18   : > { %644 = vmatmul.msk.f32.vlgmr.msrb.gmra.mxu1 %vm296_vm2, %v252_v3  ;;  %479 = vmatpush.msrb.mxu3 %v377_v20  ;;  %v550_v20 = vand.u32 127, %v549_v19 }
  0x19   : > { %452 = vmatpush.msrb.mxu2 %v381_v32  ;;  %504 = vmatpush.msra.mxu0 %v381_v32 }
  0x1a   : > { %vm552_vm11 = vcmp.eq.s32.totalorder %v550_v20, 1  ;;  %vm551_vm12 = vcmp.eq.s32.totalorder %v550_v20, 0 }
  0x1b   : > { %453 = vmatpush.msrb.mxu2 %v380_v34  ;;  %505 = vmatpush.msra.mxu0 %v380_v34 }
  0x8c   : > { %v293_v10 = vpop.f32.mrf.mxu0 }
  0x8d   : > { %v317_v11 = vpop.f32.mrf.mxu1 }
  0x8e   : > { %v318_v12 = vadd.f32 %v317_v11, %v293_v10 }
  0x90   : > { %v321_v13 = vadd.f32 %v662_v9, %v318_v12 }
  0x92   : > { %vm322_vm3 = vcmp.gt.f32.partialorder %v321_v13, 0.0  ;;  %v323_v14 = vmul.f32 0.2, %v321_v13 }
  0x94   : > { %v324_v15 = vsel %vm322_vm3, %v321_v13, %v323_v14  ;;  %v408_v27 = vpop.f32.mrf.mxu0 }
  0x95   : > { %640 = vmatmul.msk.f32.vlgmr.msra.gmra.mxu2 %vm326_vm4, %v324_v15  ;;  %v428_v30 = vpop.f32.mrf.mxu1  ;;  %v409_v31 = vadd.f32 %v665_v26, %v408_v27 }
  0x97   : > { %v429_v33 = vadd.f32 %v428_v30, %v409_v31 }
  0x99   : > { %vm431_vm6 = vcmp.gt.f32.partialorder %v429_v33, 0.0  ;;  %v432_v35 = vmul.f32 0.2, %v429_v33 }
  0x9b   : > { %v433_v36 = vsel %vm431_vm6, %v429_v33, %v432_v35 }
  0x9d   : > { %645 = vmatmul.msk.f32.vlgmr.msrb.gmra.mxu2 %vm326_vm4, %v433_v36 }
 0x118   : > { %v347_v22 = vpop.f32.mrf.mxu2 }
 0x119   : > { %v348_v23 = vadd.f32 %v663_v21, %v347_v22 }
 0x11b   : > { %v351_v24 = vmul.f32 0.2, %v348_v23  ;;  %vm350_vm5 = vcmp.gt.f32.partialorder %v348_v23, 0.0 }
 0x11d   : > { %v352_v25 = vsel %vm350_vm5, %v348_v23, %v351_v24 }
 0x11e   : > { %641 = vmatmul.msk.f32.vlgmr.msra.gmra.mxu3 %vm326_vm4, %v352_v25 }
 0x120   : > { %v455_v41 = vpop.f32.mrf.mxu2 }
 0x121   : > { %v456_v42 = vadd.f32 %v666_v40, %v455_v41 }
 0x123   : > { %v459_v44 = vmul.f32 0.2, %v456_v42  ;;  %vm458_vm7 = vcmp.gt.f32.partialorder %v456_v42, 0.0 }
 0x125   : > { %v460_v45 = vsel %vm458_vm7, %v456_v42, %v459_v44 }
 0x126   : > { %v514_v46 = vmul.f32 %v667_v43, %v460_v45 }
 0x128   : > { %v515_v47 = vsel %vm326_vm4, %v514_v46, 0.0 }
 0x129   : > { %516 = vadd.xlane.f32.xlu0 %v515_v47 }
 0x19c   : > { %v517_v58 = vpop.xlane.xlu0 %516 }
 0x19d   : > { %v519_v61 = vadd.f32 %v668_v59, %v517_v58 }
 0x1a1   : > { %v374_v38 = vpop.f32.mrf.mxu3 }
 0x1a2   : > { %v375_v39 = vadd.f32 %v664_v37, %v374_v38 }
 0x1a4   : > { %646 = vmatmul.msk.f32.vlgmr.msrb.gmra.mxu3 %vm296_vm2, %v375_v39 }
 0x227   : > { %v481_v48 = vpop.f32.mrf.mxu3 }
 0x228   : > { %v482_v49 = vadd.f32 %v481_v48, %v409_v31 }
 0x22a   : > { %vm484_vm8 = vcmp.gt.f32.partialorder %v482_v49, 0.0  ;;  %v485_v50 = vmul.f32 0.2, %v482_v49 }
 0x22c   : > { %v486_v51 = vsel %vm484_vm8, %v482_v49, %v485_v50 }
 0x22d   : > { %647 = vmatmul.msk.f32.vlgmr.msra.gmra.mxu0 %vm326_vm4, %v486_v51 }
 0x2aa   : > { %v507_v52 = vpop.f32.mrf.mxu0 }
 0x2ab   : > { %v508_v53 = vadd.f32 %v666_v40, %v507_v52 }
 0x2ad   : > { %vm510_vm9 = vcmp.gt.f32.partialorder %v508_v53, 0.0  ;;  %v511_v54 = vmul.f32 0.2, %v508_v53 }
 0x2af   : > { %v512_v55 = vsel %vm510_vm9, %v508_v53, %v511_v54 }
 0x2b0   : > { %v520_v56 = vmul.f32 %v667_v43, %v512_v55 }
 0x2b2   : > { %v521_v57 = vsel %vm326_vm4, %v520_v56, 0.0 }
 0x2b3   : > { %522 = vadd.xlane.f32.xlu0 %v521_v57 }
 0x326   : > { %v523_v60 = vpop.xlane.xlu0 %522 }
 0x327   : > { %v524_v62 = vadd.f32 %v668_v59, %v523_v60 }
 0x329   : > { %v525_v63 = vsub.f32 %v524_v62, %v519_v61  ;;  %v538_v3 = vmul.f32 %v524_v62, %v254_v0 }
 0x32b   : > { %v526_v1 = vmul.f32 %v525_v63, %v254_v0  ;;  %v539_v4 = vsel %vm527_vm10, %v538_v3, 0.0 }
 0x32d   : > { %v528_v2 = vsel %vm527_vm10, %v526_v1, 0.0 }
 0x32e   : > { %529 = vadd.xlane.f32.xlu1 %v528_v2 }
 0x336   : > { %540 = vadd.xlane.f32.xlu1 %v539_v4 }
 0x3a1   : > { %v530_v5 = vpop.xlane.xlu1 %529 }
 0x3a2   : > { %v531_v6 = vrot.slane %v530_v5, 4 }
 0x3a4   : > { %v532_v7 = vadd.f32 %v531_v6, %v530_v5 }
 0x3a6   : > { %v533_v8 = vrot.slane %v532_v7, 2 }
 0x3a8   : > { %v534_v9 = vadd.f32 %v533_v8, %v532_v7 }
 0x3a9   : > { %v541_v10 = vpop.xlane.xlu1 %540 }
 0x3aa   : > { %v542_v11 = vrot.slane %v541_v10, 4  ;;  %v535_v12 = vrot.slane %v534_v9, 1 }
 0x3ac   : > { %v543_v13 = vadd.f32 %v542_v11, %v541_v10  ;;  %v536_v14 = vadd.f32 %v535_v12, %v534_v9 }
 0x3ae   : > { %v544_v15 = vrot.slane %v543_v13, 2  ;;  %650 = vpush %v536_v14 }
 0x3b0   : > { %v545_v16 = vadd.f32 %v544_v15, %v543_v13 }
 0x3b2   : > { %v546_v17 = vrot.slane %v545_v16, 1 }
 0x3b4   : > { %v547_v18 = vadd.f32 %v546_v17, %v545_v16 }
 0x3b6   : > { %652 = vpush %v547_v18 }
 0x3df   : > { %s651_s24 = spop %650 }
 0x3e0   : > { %v555_v22 = vstv %s651_s24 }
 0x3e7   : > { %s653_s7 = spop %652 }
 0x3e8   : > { %v553_v21 = vstv %s653_s7 }
 0x3e9   : > { %v554_v23 = vsel %vm552_vm11, %v553_v21, 0.0 }
 0x3ea   : > { %v556_v24 = vsel %vm551_vm12, %v555_v22, %v554_v23 }
 0x3eb   : > { %557 = vst [vmem:[%s251_s10] sm:$0x1] %v556_v24 }
 0x3ec PF: > { %s15_s18 = sadd.s32 1, %s675_s18  }
 0x3ed   : > { %p12_p4 = scmp.ge.s32.totalorder %s15_s18, 6  }
 0x3ef   :  { %14 = sbr.rel (!%p12_p4) target bundleno = 1 (0x1), region = 76 }

</bundles_post_ra>
